<compile_context>
chip_gen: v7x
topology: tpu7x:2x2x1
jax: 0.10.0
libtpu: 0.0.40
codegen_flags: <defaults>
</compile_context>

<pallas_src>
import functools

import jax
import jax.numpy as jnp
from jax import lax
from jax.experimental import pallas as pl
from jax.experimental.pallas import tpu as pltpu

_LANE = 128
_SUBLANE = 8


def _pick_c_tile(C):
    """Channel tile: a multiple of 8 dividing C, else the full channel dim."""
    if C % _SUBLANE == 0:
        for t in (64, 32, 16, 8):
            if C % t == 0:
                return t
    return C  # block dim equal to the full array dim is always legal


def _pick_hw_tile(hw_padded, c_tile, itemsize):
    """Spatial (lane) tile: large multiple of 128, but keep one block <= ~2 MiB
    so double-buffered in+out blocks fit v5e/v6e/v7x scoped VMEM comfortably."""
    max_elems = (2 * 1024 * 1024) // max(itemsize, 1) // max(c_tile, 1)
    for t in (8192, 4096, 2048, 1024, 512, 256, 128):
        if t <= max_elems and hw_padded % t == 0:
            return t
    return _LANE  # hw_padded is always a multiple of 128


def _bn_stats_kernel(x_ref, sum_ref, sumsq_ref, *, lanes):
    """Accumulate per-channel lane-partial sum / sum-of-squares.

    x_ref:     (1, c_tile, hw_tile) in the input dtype.
    sum_ref:   (c_tile, 128) f32  -- resident accumulator (same block across the
    sumsq_ref: (c_tile, 128) f32     N / HW reduction grid axes).
    """
    @pl.when(jnp.logical_and(pl.program_id(1) == 0, pl.program_id(2) == 0))
    def _():
        sum_ref[...] = jnp.zeros_like(sum_ref)
        sumsq_ref[...] = jnp.zeros_like(sumsq_ref)

    x = x_ref[0].astype(jnp.float32)            # (c_tile, hw_tile)
    s = sum_ref[...]
    q = sumsq_ref[...]
    # 128-lane-wide VALU accumulation; the single cross-lane (XLU) reduce over
    # the 128 lanes is deferred to the wrapper epilogue.
    for c in range(lanes // _LANE):
        xc = x[:, c * _LANE:(c + 1) * _LANE]
        s = s + xc
        q = q + xc * xc
    sum_ref[...] = s
    sumsq_ref[...] = q


def _bn_norm_kernel(x_ref, scale_ref, shift_ref, y_ref):
    """y = x * scale + shift, per channel.

    x_ref/y_ref: (1, c_tile, hw_tile); scale_ref/shift_ref: (c_tile, 1) f32.
    """
    x = x_ref[0].astype(jnp.float32)            # (c_tile, hw_tile)
    y_ref[0] = (x * scale_ref[...] + shift_ref[...]).astype(y_ref.dtype)


def batchnorm2d_forward(x, weight, bias, running_mean, running_var,
                        num_batches_tracked, *, eps=1e-5, momentum=0.1):
    """Training-mode BatchNorm2d forward.

    x: (N, C, H, W).  Returns (y, new_running_mean, new_running_var,
    new_num_batches_tracked) with y of shape (N, C, H, W), dtype of x.
    """
    N, C, H, W = x.shape
    hw = H * W
    nhw = N * hw
    dtype = x.dtype

    # Free reshape to the kernel layout (no transpose, no extra HBM traffic).
    x3 = x.reshape(N, C, hw)

    # Pad the lane axis to a multiple of 128 if needed; zero padding is
    # harmless for sum / sum-of-squares since we divide by the true nhw.
    hw_p = ((hw + _LANE - 1) // _LANE) * _LANE
    if hw_p != hw:
        x3 = jnp.pad(x3, ((0, 0), (0, 0), (0, hw_p - hw)))

    c_tile = _pick_c_tile(C)
    hw_tile = _pick_hw_tile(hw_p, c_tile, jnp.dtype(dtype).itemsize)
    grid = (C // c_tile, N, hw_p // hw_tile)
    vmem_limit = 32 * 1024 * 1024

    # ---- Pass 1: per-channel lane-partial sum / sum-of-squares -------------
    stats_kernel = functools.partial(_bn_stats_kernel, lanes=hw_tile)
    lane_sum, lane_sumsq = pl.pallas_call(
        stats_kernel,
        out_shape=(
            jax.ShapeDtypeStruct((C, _LANE), jnp.float32),
            jax.ShapeDtypeStruct((C, _LANE), jnp.float32),
        ),
        grid_spec=pltpu.PrefetchScalarGridSpec(
            num_scalar_prefetch=0,
            grid=grid,
            in_specs=[
                pl.BlockSpec((1, c_tile, hw_tile),
                             lambda ci, n, hi: (n, ci, hi)),
            ],
            out_specs=[
                pl.BlockSpec((c_tile, _LANE), lambda ci, n, hi: (ci, 0)),
                pl.BlockSpec((c_tile, _LANE), lambda ci, n, hi: (ci, 0)),
            ],
        ),
        compiler_params=pltpu.CompilerParams(
            dimension_semantics=("parallel", "arbitrary", "arbitrary"),
            vmem_limit_bytes=vmem_limit),
    )(x3)

    # Tiny epilogue in plain JAX: finish the cross-lane reduce and fold the
    # affine params into per-channel scale/shift (one mul + one add / element
    # inside the normalize kernel).
    sum_c = jnp.sum(lane_sum, axis=1)                       # (C,)
    sumsq_c = jnp.sum(lane_sumsq, axis=1)                   # (C,)
    mean = sum_c / nhw
    var = jnp.maximum(sumsq_c / nhw - mean * mean, 0.0)     # biased variance
    inv_std = lax.rsqrt(var + eps)
    scale = weight.astype(jnp.float32) * inv_std            # (C,)
    shift = bias.astype(jnp.float32) - mean * scale         # (C,)

    # ---- Pass 2: normalize + affine ----------------------------------------
    y3 = pl.pallas_call(
        _bn_norm_kernel,
        out_shape=jax.ShapeDtypeStruct((N, C, hw_p), dtype),
        grid_spec=pltpu.PrefetchScalarGridSpec(
            num_scalar_prefetch=0,
            grid=grid,
            in_specs=[
                pl.BlockSpec((1, c_tile, hw_tile),
                             lambda ci, n, hi: (n, ci, hi)),
                pl.BlockSpec((c_tile, 1), lambda ci, n, hi: (ci, 0)),
                pl.BlockSpec((c_tile, 1), lambda ci, n, hi: (ci, 0)),
            ],
            out_specs=pl.BlockSpec((1, c_tile, hw_tile),
                                   lambda ci, n, hi: (n, ci, hi)),
        ),
        compiler_params=pltpu.CompilerParams(
            dimension_semantics=("parallel", "parallel", "parallel"),
            vmem_limit_bytes=vmem_limit),
    )(x3, scale.reshape(C, 1), shift.reshape(C, 1))

    if hw_p != hw:
        y3 = y3[:, :, :hw]
    y = y3.reshape(N, C, H, W)

    # Running-stat updates (buffer bookkeeping, plain JAX).  The reference
    # module updates running_var with the *biased* batch variance (it uses
    # torch.var(unbiased=False) for both normalization and the update).
    new_running_mean = ((1.0 - momentum) * running_mean
                        + momentum * mean.astype(running_mean.dtype))
    new_running_var = ((1.0 - momentum) * running_var
                       + momentum * var.astype(running_var.dtype))
    new_num_batches_tracked = num_batches_tracked + 1

    # TODO(synk): eval-mode path (normalize with running stats) and
    # momentum=None (cumulative moving average) are not implemented here.
    return y, new_running_mean, new_running_var, new_num_batches_tracked


def _reference_forward(x, weight, bias, eps):
    mean = jnp.mean(x, axis=(0, 2, 3), keepdims=True)
    var = jnp.var(x, axis=(0, 2, 3), keepdims=True)  # biased, like unbiased=False
    w = weight.reshape(1, -1, 1, 1)
    b = bias.reshape(1, -1, 1, 1)
    return (x - mean) / jnp.sqrt(var + eps) * w + b


if __name__ == "__main__":
    num_features = 4
    eps = 1e-5
    momentum = 0.1

    # Deterministic parameter / buffer init (shapes from BatchNorm2d.__init__).
    weight = jnp.ones((num_features,), jnp.float32)
    bias = jnp.zeros((num_features,), jnp.float32)
    running_mean = jnp.zeros((num_features,), jnp.float32)
    running_var = jnp.ones((num_features,), jnp.float32)
    num_batches_tracked = jnp.array(0, jnp.int32)

    key = jax.random.PRNGKey(0)
    x = jax.random.normal(key, (2, num_features, 16, 16), jnp.float32)

    y, rm, rv, nbt = batchnorm2d_forward(
        x, weight, bias, running_mean, running_var, num_batches_tracked,
        eps=eps, momentum=momentum)
    jax.block_until_ready((y, rm, rv, nbt))

    # Sanity-check against a plain-JAX reference of the PyTorch forward.
    y_ref = _reference_forward(x, weight, bias, eps)
    assert y.shape == x.shape and y.dtype == x.dtype
    assert jnp.allclose(y, y_ref, atol=1e-5, rtol=1e-5)
    batch_mean = jnp.mean(x, axis=(0, 2, 3))
    batch_var = jnp.var(x, axis=(0, 2, 3))
    assert jnp.allclose(rm, (1 - momentum) * running_mean + momentum * batch_mean,
                        atol=1e-6)
    assert jnp.allclose(rv, (1 - momentum) * running_var + momentum * batch_var,
                        atol=1e-6)
    assert int(nbt) == 1

    print("KERNEL_OK")
</pallas_src>

<mosaic_0001>
module attributes {stable_mosaic.version = 11 : i64} {
  func.func @_bn_stats_kernel(%arg0: i32, %arg1: i32, %arg2: i32, %arg3: memref<1x4x256xf32, #tpu.memory_space<vmem>>, %arg4: memref<4x128xf32, #tpu.memory_space<vmem>>, %arg5: memref<4x128xf32, #tpu.memory_space<vmem>>) attributes {dimension_semantics = [#tpu.dimension_semantics<parallel>, #tpu.dimension_semantics<arbitrary>, #tpu.dimension_semantics<arbitrary>], iteration_bounds = array<i64: 1, 2, 1>, scalar_prefetch = 0 : i64, scratch_operands = 0 : i64, tpu.core_type = #tpu.core_type<tc>, window_params = [{transform_indices = @transform_0, window_bounds = array<i64: 1, 4, 256>}, {transform_indices = @transform_1, window_bounds = array<i64: 4, 128>}, {transform_indices = @transform_2, window_bounds = array<i64: 4, 128>}]} {
    %c0_i32 = arith.constant 0 : i32
    %0 = arith.cmpi eq, %arg1, %c0_i32 : i32
    %c0_i32_0 = arith.constant 0 : i32
    %1 = arith.cmpi eq, %arg2, %c0_i32_0 : i32
    %2 = arith.andi %0, %1 : i1
    %3 = arith.extui %2 : i1 to i32
    %c0_i32_1 = arith.constant 0 : i32
    %4 = arith.cmpi ne, %3, %c0_i32_1 : i32
    scf.if %4 {
      %cst = arith.constant 0.000000e+00 : f32
      %19 = vector.broadcast %cst : f32 to vector<4x128xf32>
      %c0_12 = arith.constant 0 : index
      %c0_13 = arith.constant 0 : index
      %20 = vector.load %arg4[%c0_12, %c0_13] : memref<4x128xf32, #tpu.memory_space<vmem>>, vector<4x128xf32>
      tpu.vector_store %arg4[%c0_12, %c0_13], %19 {strides = array<i32>} : memref<4x128xf32, #tpu.memory_space<vmem>>, vector<4x128xf32>,
      %cst_14 = arith.constant 0.000000e+00 : f32
      %21 = vector.broadcast %cst_14 : f32 to vector<4x128xf32>
      %c0_15 = arith.constant 0 : index
      %c0_16 = arith.constant 0 : index
      %22 = vector.load %arg5[%c0_15, %c0_16] : memref<4x128xf32, #tpu.memory_space<vmem>>, vector<4x128xf32>
      tpu.vector_store %arg5[%c0_15, %c0_16], %21 {strides = array<i32>} : memref<4x128xf32, #tpu.memory_space<vmem>>, vector<4x128xf32>,
    } else {
    }
    %c0 = arith.constant 0 : index
    %c0_2 = arith.constant 0 : index
    %c0_3 = arith.constant 0 : index
    %5 = vector.load %arg3[%c0, %c0_2, %c0_3] : memref<1x4x256xf32, #tpu.memory_space<vmem>>, vector<1x4x256xf32>
    %6 = vector.shape_cast %5 : vector<1x4x256xf32> to vector<4x256xf32>
    %c0_4 = arith.constant 0 : index
    %c0_5 = arith.constant 0 : index
    %7 = vector.load %arg4[%c0_4, %c0_5] : memref<4x128xf32, #tpu.memory_space<vmem>>, vector<4x128xf32>
    %c0_6 = arith.constant 0 : index
    %c0_7 = arith.constant 0 : index
    %8 = vector.load %arg5[%c0_6, %c0_7] : memref<4x128xf32, #tpu.memory_space<vmem>>, vector<4x128xf32>
    %9 = vector.extract_strided_slice %6 {offsets = [0, 0], sizes = [4, 128], strides = [1, 1]} : vector<4x256xf32> to vector<4x128xf32>
    %10 = arith.addf %7, %9 : vector<4x128xf32>
    %11 = arith.mulf %9, %9 : vector<4x128xf32>
    %12 = arith.addf %8, %11 : vector<4x128xf32>
    %13 = vector.extract_strided_slice %6 {offsets = [0, 128], sizes = [4, 128], strides = [1, 1]} : vector<4x256xf32> to vector<4x128xf32>
    %14 = arith.addf %10, %13 : vector<4x128xf32>
    %15 = arith.mulf %13, %13 : vector<4x128xf32>
    %16 = arith.addf %12, %15 : vector<4x128xf32>
    %c0_8 = arith.constant 0 : index
    %c0_9 = arith.constant 0 : index
    %17 = vector.load %arg4[%c0_8, %c0_9] : memref<4x128xf32, #tpu.memory_space<vmem>>, vector<4x128xf32>
    tpu.vector_store %arg4[%c0_8, %c0_9], %14 {strides = array<i32>} : memref<4x128xf32, #tpu.memory_space<vmem>>, vector<4x128xf32>,
    %c0_10 = arith.constant 0 : index
    %c0_11 = arith.constant 0 : index
    %18 = vector.load %arg5[%c0_10, %c0_11] : memref<4x128xf32, #tpu.memory_space<vmem>>, vector<4x128xf32>
    tpu.vector_store %arg5[%c0_10, %c0_11], %16 {strides = array<i32>} : memref<4x128xf32, #tpu.memory_space<vmem>>, vector<4x128xf32>,
    return
  }
  func.func @transform_0(%arg0: i32, %arg1: i32, %arg2: i32) -> (i32, i32, i32) {
    %c0_i32 = arith.constant 0 : i32
    return %arg1, %arg0, %arg2 : i32, i32, i32
  }
  func.func @transform_1(%arg0: i32, %arg1: i32, %arg2: i32) -> (i32, i32) {
    %c0_i32 = arith.constant 0 : i32
    %c0_i32_0 = arith.constant 0 : i32
    return %arg0, %c0_i32 : i32, i32
  }
  func.func @transform_2(%arg0: i32, %arg1: i32, %arg2: i32) -> (i32, i32) {
    %c0_i32 = arith.constant 0 : i32
    %c0_i32_0 = arith.constant 0 : i32
    return %arg0, %c0_i32 : i32, i32
  }
}

</mosaic_0001>

<bundles_post_ra>
// kernel: tpu_custom_call.1
= control target key start
LH: loop header
LB: loop body
LE: loop exit
PB: predicated region body
PF: predicated region fallthrough
CT: control target
= control target key end

     0   :  { %8 = vsyncpa [#allocation3], 0  ;;  %s742_s0 = inlined_call_operand.hbm [shape: f32[2,4,256], index: 0, kind: input, shape index: {}]   ;;  %s743_s1 = inlined_call_operand.hbm [shape: f32[4,128], index: 1, kind: output, shape index: {0}]   ;;  %s744_s2 = inlined_call_operand.hbm [shape: f32[4,128], index: 2, kind: output, shape index: {1}]  }
   0x1   :  { %10 = vsyncpa [#allocation3 + $0x1], 0 }
   0x2   :  { %11 = vsyncpa [#allocation4], 0 }
   0x3   :  { %12 = vsyncpa [#allocation7], 0  ;;  %s562_s9 = smov 0   ;;  %s564_s10 = smov 0  }
   0x4   :  { %s566_s11 = smov 0   ;;  %s568_s12 = smov 0  }
   0x5   :  { %s570_s13 = smov 0   ;;  %s572_s14 = smov 0  }
   0x6 LB: > { %s313_s15 = sadd.s32 4294967295, %s541_s14   ;;  %s33_s16 = sadd.s32 1, %s537_s13  ;;  %s541_s14 = sphi %s572_s14, %s18_s14   ;;  %s537_s13 = sphi %s570_s13, %s755_s13   ;;  %s533_s12 = sphi %s568_s12, %s754_s12   ;;  %s529_s11 = sphi %s566_s11, %s753_s11   ;;  %s525_s10 = sphi %s564_s10, %s752_s10   ;;  %s521_s9 = sphi %s562_s9, %s751_s9  }
   0x7   : > { %p35_p0 = scmp.ge.s32.totalorder %s33_s16, 2  ;;  %s48_s17 = sadd.s32 1, %s529_s11 }
   0x8   : > { %p55_p1 = scmp.ne.s32.totalorder %s529_s11, %s525_s10  ;;  %p56_p2 = scmp.eq.s32.totalorder %s541_s14, 0 }
   0x9   : > { %s757_s16 = smov (%p35_p0, %s33_s16), 0  ;;  %p61_p4 = scmp.ne.s32.totalorder %s525_s10, %s521_s9 }
   0xa   : > { %p598_p3 = por %p56_p2, %p55_p1  ;;  %s41_s19 = ssub.s32 %s537_s13, %s757_s16 }
   0xb   : > { %p62_p5 = scmp.eq.s32.totalorder %s313_s15, 0  ;;  %p46_p6 = scmp.eq.s32.totalorder %s41_s19, 0 }
   0xc   : > { %p344_p8 = scmp.lt.s32.totalorder %s541_s14, 2  ;;  %s137_s22 = sand.u32 1, %s529_s11  }
   0xd   : > { %p607_p7 = por %p62_p5, %p61_p4  ;;  %s328_s23 = sshll.u32 %s537_s13, 7 }
   0xe   : > { %s613_s21 = scalar_select %p46_p6, %s529_s11, %s48_s17  }
   0xf   : > { %s316_s24 = sshll.u32 %s137_s22, 3  ;;  %s620_s27 = scalar_lea.hbm %s742_s0, %s328_s23 }
  0x10   : > { %s141_s28 = scalar_lea.vmem [#allocation2], %s316_s24  ;;  %p624_p9 = pnand %p344_p8, %p598_p3 }
  0x11   : > { %s153_s29 = sshll.u32 %s141_s28, 4  ;;  %s138_s3 = scalar_lea.sflag [#allocation3], %s137_s22  ;;  %s628_s29 = int_to_ptr.vmem [resolvable:$true] %s153_s29 }
  0x12   : > { %s401_s4 = scalar_lea.hbm %s620_s27, 128  ;;  %p403_p13 = pneg %p624_p9 }
  0x13   : > { %p402_p12 = scmp.ne.s32.totalorder %s620_s27, %s401_s4  ;;  %s406_s7 = scalar_lea.hbm %s742_s0, 256 }
  0x14   : > { %p407_p2 = scmp.lt.u32.totalorder %s620_s27, %s742_s0  ;;  %p408_p3 = scmp.lt.u32.totalorder %s406_s7, %s401_s4 }
  0x15   : > { %p404_p0 = pnand %p403_p13, %p402_p12  ;;  %p410_p5 = scmp.lt.u32.totalorder %s401_s4, %s620_s27 }
  0x16   : > { %p409_p4 = por %p408_p3, %p407_p2 }
  0x17   : > { %p405_p1 = pneg %p404_p0 }
  0x18   : > { %p411_p6 = por %p410_p5, %p409_p4 }
  0x1a   : > { %p412_p8 = pnand %p411_p6, %p405_p1 }
  0x1c   : > { %415 = shalt.err (!%p412_p8)
}
  0x1d   : > { %s416_s17 = scalar_lea.vmem %s628_s29, 128  ;;  %s543_s18 = smov [#allocation2]  }
  0x1e   : > { %p417_p12 = scmp.ne.s32.totalorder %s628_s29, %s416_s17  ;;  %s421_s19 = sshll.u32 %s543_s18, 4  ;;  %s422_s19 = int_to_ptr.vmem [resolvable:$false] %s421_s19 }
  0x1f   : > { %s423_s22 = scalar_lea.vmem %s422_s19, 256  ;;  %p424_p11 = scmp.lt.s32.totalorder %s628_s29, %s422_s19 }
  0x20   : > { %p419_p0 = pnand %p417_p12, %p403_p13  ;;  %p425_p2 = scmp.lt.s32.totalorder %s423_s22, %s416_s17 }
  0x22   : > { %p420_p10 = pneg %p419_p0  ;;  %p426_p3 = por %p425_p2, %p424_p11 }
  0x24   : > { %p427_p4 = pnand %p426_p3, %p420_p10 }
  0x26   : > { %430 = shalt.err (!%p427_p4)
}
  0x27   : > { %343 = dma.hbm_to_vmem [thread:$0]  (!%p624_p9), %s620_s27, 128, %s628_s29, %s138_s3  }
  0x28   : > { %p748_p1 = scmp.lt.s32.totalorder %s541_s14, 3  ;;  %p749_p5 = scmp.ge.s32.totalorder %s541_s14, 1 }
  0x2a   : > { %p159_p13 = pnand %p749_p5, %p748_p1 }
  0x2b   : > { %s164_s23 = sand.u32 (!%p159_p13), 1, %s525_s10  }
  0x2c   : > { %162 = sbr.rel (%p159_p13) target bundleno = 110 (0x6e), region = 24  ;;  %s320_s24 = sshll.u32 (!%p159_p13), %s164_s23, 3 }
  0x2d   : > { %s165_s25 = scalar_lea.sflag (!%p159_p13), [#allocation3], %s164_s23  ;;  %s168_s26 = scalar_lea.vmem (!%p159_p13), [#allocation2], %s320_s24 }
  0x33   : > { %508 = dma.done.wait (%p607_p7), %s165_s25, 128  }
  0x34   : > { %510 = vsyncadd (%p607_p7), %s165_s25, 4294967168  ;;  %p185_p10 = scmp.eq.s32.totalorder %s533_s12, 0 }
  0x35   : > { %v544_v0 = vmov (%p185_p10), 0.0  }
  0x36   : > { %190 = sbr.rel (!%p185_p10) target bundleno = 61 (0x3d), region = 32  ;;  %191 = vst [vmem:[#allocation5] sm:$0xf] (%p185_p10), %v544_v0  ;;  %192 = vst [vmem:[#allocation6] sm:$0xf] (%p185_p10), %v544_v0 }
  0x3d PF: > { %v193_v1 = vld [vmem:[%s168_s26] sm:$0xff]  ;;  %v194_v2 = vld [vmem:[#allocation5] sm:$0xf]  ;;  %v195_v3 = vld [vmem:[#allocation6] sm:$0xf]  ;;  %p669_p9 = scmp.eq.s32.totalorder %s313_s15, 1 }
  0x3e   : > { %v196_v4 = vadd.f32 %v194_v2, %v193_v1  ;;  %v200_v5 = vcombine.high %v193_v1, %v193_v1  ;;  %v197_v6 = vmul.f32 %v193_v1, %v193_v1  ;;  %v203_v7 = vrot.slane %v193_v1, 4  ;;  %s545_s12 = smov [#allocation5]   ;;  %s546_s28 = smov [#allocation6]  }
  0x3f   : > { %s218_s20 = sshll.u32 %s545_s12, 4  ;;  %s231_s29 = sshll.u32 %s546_s28, 4  ;;  %s219_s20 = int_to_ptr.vmem [resolvable:$true] %s218_s20  ;;  %s673_s29 = int_to_ptr.vmem [resolvable:$true] %s231_s29 }
  0x40   : > { %v202_v8 = vadd.f32 %v200_v5, %v196_v4  ;;  %v198_v9 = vadd.f32 %v197_v6, %v195_v3  ;;  %v205_v10 = vmul.f32 %v203_v7, %v203_v7  ;;  %s431_s30 = scalar_lea.vmem %s219_s20, 64  ;;  %p438_p8 = scmp.lt.s32.totalorder %s219_s20, %s219_s20 }
  0x41   : > { %p432_p7 = scmp.ne.s32.totalorder %s219_s20, %s431_s30  ;;  %p439_p12 = scmp.lt.s32.totalorder %s431_s30, %s431_s30 }
  0x42   : > { %207 = vst [vmem:[#allocation5] sm:$0xf] %v202_v8  ;;  %v206_v11 = vadd.f32 %v205_v10, %v198_v9 }
  0x43   : > { %p433_p11 = pnand %p432_p7, %p669_p9  ;;  %p440_p0 = por %p439_p12, %p438_p8 }
  0x45   : > { %p434_p6 = pneg %p433_p11 }
  0x47   : > { %p441_p2 = pnand %p440_p0, %p434_p6 }
  0x49   : > { %444 = shalt.err (!%p441_p2)
}
  0x4a   : > { %s445_s4 = scalar_lea.hbm %s743_s1, 64 }
  0x4b   : > { %p446_p3 = scmp.ne.s32.totalorder %s743_s1, %s445_s4  ;;  %p451_p5 = scmp.lt.u32.totalorder %s445_s4, %s743_s1 }
  0x4d   : > { %p447_p4 = pnand %p446_p3, %p669_p9 }
  0x4f   : > { %p448_p1 = pneg %p447_p4 }
  0x51   : > { %p453_p13 = pnand %p451_p5, %p448_p1 }
  0x53   : > { %456 = shalt.err (!%p453_p13)
}
  0x54   : > { %333 = dma.vmem_to_hbm [thread:$0]  (%p669_p9), %s219_s20, 64, %s743_s1, [#allocation4]   ;;  %208 = vst [vmem:[#allocation6] sm:$0xf] %v206_v11 }
  0x55   : > { %s457_s18 = scalar_lea.vmem %s673_s29, 64  ;;  %p464_p6 = scmp.lt.s32.totalorder %s673_s29, %s673_s29 }
  0x56   : > { %p458_p10 = scmp.ne.s32.totalorder %s673_s29, %s457_s18  ;;  %p465_p8 = scmp.lt.s32.totalorder %s457_s18, %s457_s18 }
  0x58   : > { %p459_p7 = pnand %p458_p10, %p669_p9  ;;  %p466_p12 = por %p465_p8, %p464_p6 }
  0x5a   : > { %p460_p11 = pneg %p459_p7 }
  0x5c   : > { %p467_p0 = pnand %p466_p12, %p460_p11 }
  0x5e   : > { %470 = shalt.err (!%p467_p0)
}
  0x5f   : > { %s471_s23 = scalar_lea.hbm %s744_s2, 64 }
  0x60   : > { %p472_p2 = scmp.ne.s32.totalorder %s744_s2, %s471_s23  ;;  %p477_p1 = scmp.lt.u32.totalorder %s471_s23, %s744_s2 }
  0x62   : > { %p473_p3 = pnand %p472_p2, %p669_p9 }
  0x64   : > { %p474_p4 = pneg %p473_p3 }
  0x66   : > { %p479_p5 = pnand %p477_p1, %p474_p4 }
  0x68   : > { %482 = shalt.err (!%p479_p5)
}
  0x69   : > { %335 = dma.vmem_to_hbm [thread:$0]  (%p669_p9), %s673_s29, 64, %s744_s2, [#allocation7]  }
  0x6a   : > { %512 = dma.done.wait (%p669_p9), [#allocation4], 64  }
  0x6b   : > { %514 = vsyncadd (%p669_p9), [#allocation4], 4294967232 }
  0x6c   : > { %516 = dma.done.wait (%p669_p9), [#allocation7], 64  }
  0x6d   : > { %518 = vsyncadd (%p669_p9), [#allocation7], 4294967232 }
  0x6e PF: > { %s18_s14 = sadd.s32 1, %s541_s14   ;;  %s751_s9 = smov %s525_s10 }
  0x6f   : > { %p15_p13 = scmp.ge.s32.totalorder %s18_s14, 4   ;;  %s752_s10 = smov %s529_s11 }
  0x70   : > { %s753_s11 = smov %s613_s21  ;;  %s754_s12 = smov %s537_s13 }
  0x71   : > { %s755_s13 = smov %s757_s16  ;;  %17 = sbr.rel (!%p15_p13) target bundleno = 6 (0x6), region = 75 }
  0x78   :  { %248 = vsyncpa [#allocation3], 1 }
  0x79   :  { %250 = vsyncpa [#allocation3 + $0x1], 1 }
  0x7a   :  { %251 = vsyncpa [#allocation4], 1 }
  0x7b   :  { %253 = vsyncpa [#allocation4 + $0x1], 1 }
  0x7c   :  { %254 = vsyncpa [#allocation7], 1 }

</bundles_post_ra>
